<compile_context>
chip_gen: v7x
topology: tpu7x:2x2x1
jax: 0.10.0
libtpu: 0.0.40
codegen_flags: <defaults>
</compile_context>

<pallas_src>
import functools

import jax
import jax.numpy as jnp
from jax.experimental import pallas as pl
from jax.experimental.pallas import tpu as pltpu

INPSIZ = 784
HIDENSIZ = 500
NUMCLASES = 10

HIDENSIZ_PAD = 512    # 500 -> multiple of 128: clean MXU tiling for layer 2
NUMCLASES_PAD = 128   # 10  -> one full lane width: unmasked output stores


def _round_up(x, m):
    return (x + m - 1) // m * m


def _mlp_kernel(x_ref, w1_ref, b1_ref, w2_ref, b2_ref, out_ref):
    # x_ref:  (TB, 784) f32    w1_ref: (784, 512) bf16   b1_ref: (1, 512) f32
    # w2_ref: (512, 128) bf16  b2_ref: (1, 128)   f32    out_ref: (TB, 128) bf16
    x = x_ref[...].astype(jnp.bfloat16)          # in-kernel cast: no extra HBM pass
    h = jnp.dot(x, w1_ref[...], preferred_element_type=jnp.float32)
    h = jnp.maximum(h + b1_ref[...], 0.0)        # bias + ReLU in f32 (v5e-safe epilogue)
    o = jnp.dot(h.astype(jnp.bfloat16), w2_ref[...],
                preferred_element_type=jnp.float32)
    out_ref[...] = (o + b2_ref[...]).astype(out_ref.dtype)   # bf16, lane-dense store


def prepare_params(w1, b1, w2, b2):
    """One-time param prep (do NOT redo per call): transpose PyTorch (out,in)
    weights to (in,out), pad to lane-aligned shapes, cast weights to bf16."""
    w1_t = jnp.zeros((INPSIZ, HIDENSIZ_PAD), jnp.bfloat16)
    w1_t = w1_t.at[:, :HIDENSIZ].set(jnp.transpose(w1).astype(jnp.bfloat16))
    b1_p = jnp.zeros((1, HIDENSIZ_PAD), jnp.float32).at[0, :HIDENSIZ].set(b1)
    w2_t = jnp.zeros((HIDENSIZ_PAD, NUMCLASES_PAD), jnp.bfloat16)
    w2_t = w2_t.at[:HIDENSIZ, :NUMCLASES].set(
        jnp.transpose(w2).astype(jnp.bfloat16))
    b2_p = jnp.zeros((1, NUMCLASES_PAD), jnp.float32).at[0, :NUMCLASES].set(b2)
    return w1_t, b1_p, w2_t, b2_p


@functools.partial(jax.jit, static_argnames=("block_b",))
def mlp_forward(x, w1_t, b1_p, w2_t, b2_p, *, block_b=512):
    """Forward pass of neural_network.

    Args:
      x:    (B, 784) float32 activations.
      w1_t: (784, 512) bf16, b1_p: (1, 512) f32   (from prepare_params)
      w2_t: (512, 128) bf16, b2_p: (1, 128) f32
    Returns:
      (B, 10) float32 logits (computed with bf16 matmul operands, f32 accumulation,
      bf16 output store -- ~1e-2 absolute agreement with a full-f32 reference).
    """
    B = x.shape[0]
    # Batch tile: multiple of 8 sublanes, capped at block_b, and <= ceil(B/2) so the
    # "parallel" grid axis has >= 2 steps whenever possible (v7x dual-TC sharding).
    tb = max(8, min(block_b, _round_up(pl.cdiv(B, 2), 8)))
    grid = (pl.cdiv(B, tb),)   # ragged last tile is edge-clipped by Pallas (no jnp.pad)

    flops = 2 * B * (INPSIZ * HIDENSIZ_PAD + HIDENSIZ_PAD * NUMCLASES_PAD)
    bytes_accessed = (B * INPSIZ * 4                              # x (f32 read)
                      + INPSIZ * HIDENSIZ_PAD * 2 + HIDENSIZ_PAD * 4    # w1 + b1
                      + HIDENSIZ_PAD * NUMCLASES_PAD * 2 + NUMCLASES_PAD * 4  # w2 + b2
                      + B * NUMCLASES_PAD * 2)                    # out (bf16 write)

    out = pl.pallas_call(
        _mlp_kernel,
        out_shape=jax.ShapeDtypeStruct((B, NUMCLASES_PAD), jnp.bfloat16),
        grid=grid,
        in_specs=[
            # x tile marches over the batch; weights/biases stay VMEM-resident (0,0).
            pl.BlockSpec((tb, INPSIZ), lambda i: (i, 0)),
            pl.BlockSpec((INPSIZ, HIDENSIZ_PAD), lambda i: (0, 0)),
            pl.BlockSpec((1, HIDENSIZ_PAD), lambda i: (0, 0)),
            pl.BlockSpec((HIDENSIZ_PAD, NUMCLASES_PAD), lambda i: (0, 0)),
            pl.BlockSpec((1, NUMCLASES_PAD), lambda i: (0, 0)),
        ],
        out_specs=pl.BlockSpec((tb, NUMCLASES_PAD), lambda i: (i, 0)),
        compiler_params=pltpu.CompilerParams(
            dimension_semantics=("parallel",),   # megacore / v7x dual-TC sharding
            vmem_limit_bytes=16 << 20,           # ~1 MB weights + double-buffered tiles
        ),
        cost_estimate=pl.CostEstimate(
            flops=flops, transcendentals=0, bytes_accessed=bytes_accessed),
    )(x, w1_t, b1_p, w2_t, b2_p)

    return out[:, :NUMCLASES].astype(jnp.float32)


def init_params(key):
    """Deterministic param init mimicking nn.Linear default (uniform +/- 1/sqrt(fan_in))."""
    k1, k2, k3, k4 = jax.random.split(key, 4)
    bound1 = 1.0 / jnp.sqrt(jnp.float32(INPSIZ))
    bound2 = 1.0 / jnp.sqrt(jnp.float32(HIDENSIZ))
    w1 = jax.random.uniform(k1, (HIDENSIZ, INPSIZ), jnp.float32, -bound1, bound1)
    b1 = jax.random.uniform(k2, (HIDENSIZ,), jnp.float32, -bound1, bound1)
    w2 = jax.random.uniform(k3, (NUMCLASES, HIDENSIZ), jnp.float32, -bound2, bound2)
    b2 = jax.random.uniform(k4, (NUMCLASES,), jnp.float32, -bound2, bound2)
    return w1, b1, w2, b2


def _reference(x, w1, b1, w2, b2):
    # Plain-JAX reference with matching bf16 rounding of matmul operands
    # (accumulation stays f32, same as the kernel; kernel additionally stores
    # the logits in bf16, which the 1e-2 tolerance absorbs).
    rb = lambda a: a.astype(jnp.bfloat16).astype(jnp.float32)
    h = jnp.maximum(rb(x) @ rb(w1).T + b1, 0.0)
    return rb(h) @ rb(w2).T + b2


if __name__ == "__main__":
    key = jax.random.PRNGKey(0)
    kx, kp = jax.random.split(key)
    w1, b1, w2, b2 = init_params(kp)
    params = prepare_params(w1, b1, w2, b2)

    # Small single-tile case (B=8 -> tb=8, grid=(1,)).
    B = 8
    x = jax.random.normal(kx, (B, INPSIZ), jnp.float32)
    out = jax.block_until_ready(mlp_forward(x, *params))
    ref = _reference(x, w1, b1, w2, b2)
    assert out.shape == (B, NUMCLASES)
    assert jnp.allclose(out, ref, atol=1e-2, rtol=1e-2), float(
        jnp.max(jnp.abs(out - ref)))

    # Multi-tile case exercising the batch grid + ragged edge-clipped last tile
    # (B=300 -> tb=152, grid=(2,), last block clipped at row 300; no padding pass).
    B2 = 300
    x2 = jax.random.normal(jax.random.PRNGKey(1), (B2, INPSIZ), jnp.float32)
    out2 = jax.block_until_ready(mlp_forward(x2, *params))
    ref2 = _reference(x2, w1, b1, w2, b2)
    assert out2.shape == (B2, NUMCLASES)
    assert jnp.allclose(out2, ref2, atol=1e-2, rtol=1e-2), float(
        jnp.max(jnp.abs(out2 - ref2)))

    print("KERNEL_OK")
</pallas_src>

<mosaic_0001>
module attributes {stable_mosaic.version = 11 : i64} {
  func.func @_mlp_kernel(%arg0: i32, %arg1: memref<8x784xf32, #tpu.memory_space<vmem>>, %arg2: memref<784x512xbf16, #tpu.memory_space<vmem>>, %arg3: memref<1x512xf32, #tpu.memory_space<vmem>>, %arg4: memref<512x128xbf16, #tpu.memory_space<vmem>>, %arg5: memref<1x128xf32, #tpu.memory_space<vmem>>, %arg6: memref<8x128xbf16, #tpu.memory_space<vmem>>) attributes {dimension_semantics = [#tpu.dimension_semantics<parallel>], iteration_bounds = array<i64: 1>, scalar_prefetch = 0 : i64, scratch_operands = 0 : i64, tpu.core_type = #tpu.core_type<tc>, window_params = [{transform_indices = @transform_0, window_bounds = array<i64: 8, 784>}, {pipeline_mode = #tpu.pipeline_mode<synchronous>, transform_indices = @transform_1, window_bounds = array<i64: 784, 512>}, {pipeline_mode = #tpu.pipeline_mode<synchronous>, transform_indices = @transform_2, window_bounds = array<i64: 1, 512>}, {pipeline_mode = #tpu.pipeline_mode<synchronous>, transform_indices = @transform_3, window_bounds = array<i64: 512, 128>}, {pipeline_mode = #tpu.pipeline_mode<synchronous>, transform_indices = @transform_4, window_bounds = array<i64: 1, 128>}, {transform_indices = @transform_5, window_bounds = array<i64: 8, 128>}]} {
    %c0 = arith.constant 0 : index
    %c0_0 = arith.constant 0 : index
    %0 = vector.load %arg1[%c0, %c0_0] : memref<8x784xf32, #tpu.memory_space<vmem>>, vector<8x784xf32>
    %1 = arith.truncf %0 : vector<8x784xf32> to vector<8x784xbf16>
    %c0_1 = arith.constant 0 : index
    %c0_2 = arith.constant 0 : index
    %2 = vector.load %arg2[%c0_1, %c0_2] : memref<784x512xbf16, #tpu.memory_space<vmem>>, vector<784x512xbf16>
    %cst = arith.constant dense<0.000000e+00> : vector<8x512xf32>
    %3 = tpu.matmul %1, %2, %cst {dimension_numbers = #tpu.dot_dimension_numbers<[1], [0], [0], [1], [0, 0, 1, 1], [], []>} : vector<8x784xbf16>, vector<784x512xbf16>, vector<8x512xf32> -> vector<8x512xf32>
    %c0_3 = arith.constant 0 : index
    %c0_4 = arith.constant 0 : index
    %4 = vector.load %arg3[%c0_3, %c0_4] : memref<1x512xf32, #tpu.memory_space<vmem>>, vector<1x512xf32>
    %5 = vector.broadcast %4 : vector<1x512xf32> to vector<8x512xf32>
    %6 = arith.addf %3, %5 : vector<8x512xf32>
    %cst_5 = arith.constant 0.000000e+00 : f32
    %7 = vector.broadcast %cst_5 : f32 to vector<8x512xf32>
    %8 = arith.maximumf %6, %7 : vector<8x512xf32>
    %9 = arith.truncf %8 : vector<8x512xf32> to vector<8x512xbf16>
    %c0_6 = arith.constant 0 : index
    %c0_7 = arith.constant 0 : index
    %10 = vector.load %arg4[%c0_6, %c0_7] : memref<512x128xbf16, #tpu.memory_space<vmem>>, vector<512x128xbf16>
    %cst_8 = arith.constant dense<0.000000e+00> : vector<8x128xf32>
    %11 = tpu.matmul %9, %10, %cst_8 {dimension_numbers = #tpu.dot_dimension_numbers<[1], [0], [0], [1], [0, 0, 1, 1], [], []>} : vector<8x512xbf16>, vector<512x128xbf16>, vector<8x128xf32> -> vector<8x128xf32>
    %c0_9 = arith.constant 0 : index
    %c0_10 = arith.constant 0 : index
    %12 = vector.load %arg5[%c0_9, %c0_10] : memref<1x128xf32, #tpu.memory_space<vmem>>, vector<1x128xf32>
    %13 = vector.broadcast %12 : vector<1x128xf32> to vector<8x128xf32>
    %14 = arith.addf %11, %13 : vector<8x128xf32>
    %15 = arith.truncf %14 : vector<8x128xf32> to vector<8x128xbf16>
    %c0_11 = arith.constant 0 : index
    %c0_12 = arith.constant 0 : index
    %16 = vector.load %arg6[%c0_11, %c0_12] : memref<8x128xbf16, #tpu.memory_space<vmem>>, vector<8x128xbf16>
    tpu.vector_store %arg6[%c0_11, %c0_12], %15 {strides = array<i32>} : memref<8x128xbf16, #tpu.memory_space<vmem>>, vector<8x128xbf16>,
    return
  }
  func.func @transform_0(%arg0: i32) -> (i32, i32) {
    %c0_i32 = arith.constant 0 : i32
    %c0_i32_0 = arith.constant 0 : i32
    return %arg0, %c0_i32 : i32, i32
  }
  func.func @transform_1(%arg0: i32) -> (i32, i32) {
    %c0_i32 = arith.constant 0 : i32
    %c0_i32_0 = arith.constant 0 : i32
    %c0_i32_1 = arith.constant 0 : i32
    return %c0_i32, %c0_i32_0 : i32, i32
  }
  func.func @transform_2(%arg0: i32) -> (i32, i32) {
    %c0_i32 = arith.constant 0 : i32
    %c0_i32_0 = arith.constant 0 : i32
    %c0_i32_1 = arith.constant 0 : i32
    return %c0_i32, %c0_i32_0 : i32, i32
  }
  func.func @transform_3(%arg0: i32) -> (i32, i32) {
    %c0_i32 = arith.constant 0 : i32
    %c0_i32_0 = arith.constant 0 : i32
    %c0_i32_1 = arith.constant 0 : i32
    return %c0_i32, %c0_i32_0 : i32, i32
  }
  func.func @transform_4(%arg0: i32) -> (i32, i32) {
    %c0_i32 = arith.constant 0 : i32
    %c0_i32_0 = arith.constant 0 : i32
    %c0_i32_1 = arith.constant 0 : i32
    return %c0_i32, %c0_i32_0 : i32, i32
  }
  func.func @transform_5(%arg0: i32) -> (i32, i32) {
    %c0_i32 = arith.constant 0 : i32
    %c0_i32_0 = arith.constant 0 : i32
    return %arg0, %c0_i32 : i32, i32
  }
}

</mosaic_0001>

<bundles_post_ra>
// kernel: mlp_forward.1
= control target key start
LH: loop header
LB: loop body
LE: loop exit
PB: predicated region body
PF: predicated region fallthrough
CT: control target
= control target key end

     0   :  { %10 = vsyncpa [#allocation3], 0  ;;  %s2753_s0 = inlined_call_operand.hbm [shape: f32[8,784], index: 0, kind: input, shape index: {}]   ;;  %s2754_s1 = inlined_call_operand.hbm [shape: bf16[784,512], index: 1, kind: input, shape index: {}]   ;;  %s2755_s2 = inlined_call_operand.vmem [shape: f32[1,512], index: 2, kind: input, shape index: {}]   ;;  %s2756_s3 = inlined_call_operand.hbm [shape: bf16[512,128], index: 3, kind: input, shape index: {}]   ;;  %s2757_s4 = inlined_call_operand.vmem [shape: f32[1,128], index: 4, kind: input, shape index: {}]   ;;  %s2758_s5 = inlined_call_operand.vmem [shape: bf16[8,128], index: 5, kind: output, shape index: {}]  }
   0x1   :  { %11 = vsyncpa [#allocation5], 0  ;;  %s2670_s18 = smov [#allocation4]   ;;  %s2600_s22 = scalar_lea.hbm %s2754_s1, 25088 }
   0x2   :  { %s27_s19 = sshll.u32 %s2670_s18, 4  ;;  %p2601_p0 = scmp.ne.s32.totalorder %s2754_s1, %s2600_s22  ;;  %s28_s19 = int_to_ptr.vmem [resolvable:$true] %s27_s19 }
   0x3   :  { %p2604_p1 = scmp.lt.u32.totalorder %s2600_s22, %s2754_s1 }
   0x5   :  { %p2606_p2 = pnand %p2604_p1, %p2601_p0 }
   0x7   :  { %2609 = shalt.err (!%p2606_p2)
}
   0x8   :  { %s2610_s27 = scalar_lea.vmem %s28_s19, 25088  ;;  %p2615_p4 = scmp.lt.s32.totalorder %s28_s19, %s28_s19 }
   0x9   :  { %p2611_p3 = scmp.ne.s32.totalorder %s28_s19, %s2610_s27  ;;  %p2616_p5 = scmp.lt.s32.totalorder %s2610_s27, %s2610_s27 }
   0xb   :  { %p2617_p6 = por %p2616_p5, %p2615_p4 }
   0xd   :  { %p2618_p7 = pnand %p2617_p6, %p2611_p3 }
   0xf   :  { %2621 = shalt.err (!%p2618_p7)
}
  0x10   :  { %s2671_s28 = smov 256   ;;  %s2672_s29 = smov 16  }
  0x11   :  { %33 = dma.hbm_to_vmem [thread:$0]  %s2754_s1, 25088, %s28_s19, [#allocation5], %s2671_s28, %s2671_s28, %s2672_s29  }
  0x12   :  { %s2673_s7 = smov [#allocation2]   ;;  %s2674_s9 = smov [#allocation6]  }
  0x13   :  { %s18_s8 = sshll.u32 %s2673_s7, 4  ;;  %s41_s10 = sshll.u32 %s2674_s9, 4  ;;  %s19_s8 = int_to_ptr.vmem [resolvable:$true] %s18_s8  ;;  %s42_s10 = int_to_ptr.vmem [resolvable:$true] %s41_s10 }
  0x14   :  { %s2622_s13 = scalar_lea.hbm %s2753_s0, 896 }
  0x15   :  { %p2623_p8 = scmp.ne.s32.totalorder %s2753_s0, %s2622_s13  ;;  %p2626_p9 = scmp.lt.u32.totalorder %s2622_s13, %s2753_s0 }
  0x17   :  { %p2628_p10 = pnand %p2626_p9, %p2623_p8 }
  0x19   :  { %2631 = shalt.err (!%p2628_p10)
}
  0x1a   :  { %s2632_s1 = scalar_lea.vmem %s19_s8, 896  ;;  %p2637_p12 = scmp.lt.s32.totalorder %s19_s8, %s19_s8 }
  0x1b   :  { %p2633_p11 = scmp.ne.s32.totalorder %s19_s8, %s2632_s1  ;;  %p2638_p13 = scmp.lt.s32.totalorder %s2632_s1, %s2632_s1 }
  0x1d   :  { %p2639_p0 = por %p2638_p13, %p2637_p12 }
  0x1f   :  { %p2640_p1 = pnand %p2639_p0, %p2633_p11 }
  0x21   :  { %2643 = shalt.err (!%p2640_p1)
}
  0x22   :  { %21 = dma.hbm_to_vmem [thread:$0]  %s2753_s0, 896, %s19_s8, [#allocation3]  }
  0x23   :  { %s2644_s22 = scalar_lea.hbm %s2756_s3, 4096 }
  0x24   :  { %p2645_p2 = scmp.ne.s32.totalorder %s2756_s3, %s2644_s22  ;;  %p2648_p3 = scmp.lt.u32.totalorder %s2644_s22, %s2756_s3 }
  0x26   :  { %p2650_p4 = pnand %p2648_p3, %p2645_p2 }
  0x28   :  { %2653 = shalt.err (!%p2650_p4)
}
  0x29   :  { %s2654_s27 = scalar_lea.vmem %s42_s10, 4096  ;;  %p2659_p6 = scmp.lt.s32.totalorder %s42_s10, %s42_s10 }
  0x2a   :  { %p2655_p5 = scmp.ne.s32.totalorder %s42_s10, %s2654_s27  ;;  %p2660_p7 = scmp.lt.s32.totalorder %s2654_s27, %s2654_s27 }
  0x2c   :  { %p2661_p8 = por %p2660_p7, %p2659_p6 }
  0x2e   :  { %p2662_p9 = pnand %p2661_p8, %p2655_p5 }
  0x30   :  { %2665 = shalt.err (!%p2662_p9)
}
  0x31   :  { %s2675_s0 = smov 64   ;;  %s2676_s28 = smov 4  }
  0x32   :  { %47 = dma.hbm_to_vmem [thread:$0]  %s2756_s3, 4096, %s42_s10, [#allocation5], %s2675_s0, %s2675_s0, %s2676_s28  }
  0x33   :  { %2666 = dma.done.wait [#allocation3], 896  }
  0x34   :  { %2667 = vsyncadd [#allocation3], 4294966400 }
  0x35   :  { %2668 = dma.done.wait [#allocation5], 29184  }
  0x36   :  { %2669 = vsyncadd [#allocation5], 4294938112  ;;  %v2274_v0 = vld [vmem:[#allocation4 + $0x4] ss:$16 sps:$4 sm:$0xff]   ;;  %v2276_v1 = vld [vmem:[#allocation4 + $0xc] ss:$16 sps:$4 sm:$0xff]  }
  0x37   :  { %1276 = vmatprep.subr.bf16.mxu0 %v2274_v0  ;;  %v2278_v2 = vld [vmem:[#allocation4] ss:$16 sps:$4 sm:$0xff]   ;;  %v2279_v3 = vld [vmem:[#allocation4 + $0x8] ss:$16 sps:$4 sm:$0xff]   ;;  %1440 = vmatprep.subr.bf16.mxu1 %v2276_v1  ;;  %v2280_v4 = vld [vmem:[#allocation4 + $0x24] ss:$16 sps:$4 sm:$0xff]  }
  0x38   :  { %1277 = vmatpush1.bf16.msra.mxu0 %v2278_v2  ;;  %1441 = vmatpush1.bf16.msra.mxu1 %v2279_v3  ;;  %v2282_v5 = vld [vmem:[#allocation4 + $0x2c] ss:$16 sps:$4 sm:$0xff]   ;;  %v2284_v6 = vld [vmem:[#allocation4 + $0x20] ss:$16 sps:$4 sm:$0xff]   ;;  %v2285_v7 = vld [vmem:[#allocation4 + $0x28] ss:$16 sps:$4 sm:$0xff]  }
  0x39   :  { %1278 = vmatprep.subr.bf16.mxu0 %v2280_v4  ;;  %1442 = vmatprep.subr.bf16.mxu1 %v2282_v5  ;;  %v2286_v8 = vld [vmem:[#allocation4 + $0x44] ss:$16 sps:$4 sm:$0xff]   ;;  %v2288_v9 = vld [vmem:[#allocation4 + $0x4c] ss:$16 sps:$4 sm:$0xff]   ;;  %v2290_v10 = vld [vmem:[#allocation4 + $0x40] ss:$16 sps:$4 sm:$0xff]  }
  0x3a   :  { %v2291_v11 = vld [vmem:[#allocation4 + $0x48] ss:$16 sps:$4 sm:$0xff]   ;;  %v2292_v12 = vld [vmem:[#allocation4 + $0x64] ss:$16 sps:$4 sm:$0xff]   ;;  %v2294_v13 = vld [vmem:[#allocation4 + $0x6c] ss:$16 sps:$4 sm:$0xff]  }
  0x3b   :  { %v2296_v14 = vld [vmem:[#allocation4 + $0x60] ss:$16 sps:$4 sm:$0xff]   ;;  %v2297_v15 = vld [vmem:[#allocation4 + $0x68] ss:$16 sps:$4 sm:$0xff]   ;;  %v2298_v16 = vld [vmem:[#allocation4 + $0x84] ss:$16 sps:$4 sm:$0xff]  }
  0x3c   :  { %1279 = vmatpush1.bf16.msra.mxu0 %v2284_v6  ;;  %1443 = vmatpush1.bf16.msra.mxu1 %v2285_v7  ;;  %v2300_v17 = vld [vmem:[#allocation4 + $0x8c] ss:$16 sps:$4 sm:$0xff]   ;;  %v2302_v18 = vld [vmem:[#allocation4 + $0x80] ss:$16 sps:$4 sm:$0xff]   ;;  %v2303_v19 = vld [vmem:[#allocation4 + $0x88] ss:$16 sps:$4 sm:$0xff]  }
  0x3d   :  { %1280 = vmatprep.subr.bf16.mxu0 %v2286_v8  ;;  %1444 = vmatprep.subr.bf16.mxu1 %v2288_v9  ;;  %v2304_v20 = vld [vmem:[#allocation4 + $0xa4] ss:$16 sps:$4 sm:$0xff]   ;;  %v2306_v21 = vld [vmem:[#allocation4 + $0xac] ss:$16 sps:$4 sm:$0xff]   ;;  %v2308_v22 = vld [vmem:[#allocation4 + $0xa0] ss:$16 sps:$4 sm:$0xff]  }
  0x3e   :  { %v2309_v23 = vld [vmem:[#allocation4 + $0xa8] ss:$16 sps:$4 sm:$0xff]   ;;  %v2310_v24 = vld [vmem:[#allocation4 + $0xc4] ss:$16 sps:$4 sm:$0xff]   ;;  %v2312_v25 = vld [vmem:[#allocation4 + $0xcc] ss:$16 sps:$4 sm:$0xff]  }
  0x3f   :  { %v2314_v26 = vld [vmem:[#allocation4 + $0xc0] ss:$16 sps:$4 sm:$0xff]   ;;  %v2315_v27 = vld [vmem:[#allocation4 + $0xc8] ss:$16 sps:$4 sm:$0xff]   ;;  %v2316_v28 = vld [vmem:[#allocation4 + $0xe4] ss:$16 sps:$4 sm:$0xff]  }
  0x40   :  { %1281 = vmatpush1.bf16.msra.mxu0 %v2290_v10  ;;  %1445 = vmatpush1.bf16.msra.mxu1 %v2291_v11  ;;  %v2318_v29 = vld [vmem:[#allocation4 + $0xec] ss:$16 sps:$4 sm:$0xff]   ;;  %v2320_v30 = vld [vmem:[#allocation4 + $0xe0] ss:$16 sps:$4 sm:$0xff]   ;;  %v2321_v31 = vld [vmem:[#allocation4 + $0xe8] ss:$16 sps:$4 sm:$0xff]  }
  0x41   :  { %1282 = vmatprep.subr.bf16.mxu0 %v2292_v12  ;;  %1446 = vmatprep.subr.bf16.mxu1 %v2294_v13  ;;  %v2322_v32 = vld [vmem:[#allocation4 + $0x104] ss:$16 sps:$4 sm:$0xff]   ;;  %v2324_v33 = vld [vmem:[#allocation4 + $0x10c] ss:$16 sps:$4 sm:$0xff]   ;;  %v2326_v34 = vld [vmem:[#allocation4 + $0x100] ss:$16 sps:$4 sm:$0xff]  }
  0x42   :  { %v2327_v35 = vld [vmem:[#allocation4 + $0x108] ss:$16 sps:$4 sm:$0xff]   ;;  %v2328_v36 = vld [vmem:[#allocation4 + $0x124] ss:$16 sps:$4 sm:$0xff]   ;;  %v2330_v37 = vld [vmem:[#allocation4 + $0x12c] ss:$16 sps:$4 sm:$0xff]  }
  0x43   :  { %v2332_v38 = vld [vmem:[#allocation4 + $0x120] ss:$16 sps:$4 sm:$0xff]   ;;  %v2333_v39 = vld [vmem:[#allocation4 + $0x128] ss:$16 sps:$4 sm:$0xff]   ;;  %v2334_v40 = vld [vmem:[#allocation4 + $0x144] ss:$16 sps:$4 sm:$0xff]  }
  0x44   :  { %1283 = vmatpush1.bf16.msra.mxu0 %v2296_v14  ;;  %1447 = vmatpush1.bf16.msra.mxu1 %v2297_v15  ;;  %v2336_v41 = vld [vmem:[#allocation4 + $0x14c] ss:$16 sps:$4 sm:$0xff]   ;;  %v2338_v42 = vld [vmem:[#allocation4 + $0x140] ss:$16 sps:$4 sm:$0xff]   ;;  %v2339_v43 = vld [vmem:[#allocation4 + $0x148] ss:$16 sps:$4 sm:$0xff]  }
  0x45   :  { %1284 = vmatprep.subr.bf16.mxu0 %v2298_v16  ;;  %1448 = vmatprep.subr.bf16.mxu1 %v2300_v17  ;;  %v2340_v44 = vld [vmem:[#allocation4 + $0x164] ss:$16 sps:$4 sm:$0xff]   ;;  %v2342_v45 = vld [vmem:[#allocation4 + $0x16c] ss:$16 sps:$4 sm:$0xff]   ;;  %v2344_v47 = vld [vmem:[#allocation4 + $0x160] ss:$16 sps:$4 sm:$0xff]  }
  0x46   :  { %v61_v46 = vld [vmem:[#allocation2 + $0x8] sm:$0xff]  ;;  %v2345_v49 = vld [vmem:[#allocation4 + $0x168] ss:$16 sps:$4 sm:$0xff]   ;;  %v2348_v51 = vld [vmem:[#allocation4 + $0x18c] ss:$16 sps:$4 sm:$0xff]   ;;  %vm1272_vm0 = vcmask 130048  }
  0x47   :  { %v68_v48 = vpack.c.bf16 %v61_v46, %v61_v46  ;;  %v2346_v50 = vld [vmem:[#allocation4 + $0x184] ss:$16 sps:$4 sm:$0xff]   ;;  %v2350_v52 = vld [vmem:[#allocation4 + $0x180] ss:$16 sps:$4 sm:$0xff]   ;;  %v2351_v53 = vld [vmem:[#allocation4 + $0x188] ss:$16 sps:$4 sm:$0xff]  }
  0x48   :  { %1285 = vmatpush1.bf16.msra.mxu0 %v2302_v18  ;;  %1449 = vmatpush1.bf16.msra.mxu1 %v2303_v19  ;;  %v2352_v54 = vld [vmem:[#allocation4 + $0x1a4] ss:$16 sps:$4 sm:$0xff]   ;;  %v2354_v55 = vld [vmem:[#allocation4 + $0x1ac] ss:$16 sps:$4 sm:$0xff]   ;;  %v2356_v56 = vld [vmem:[#allocation4 + $0x1a0] ss:$16 sps:$4 sm:$0xff]  }
  0x49   :  { %1286 = vmatprep.subr.bf16.mxu0 %v2304_v20  ;;  %1450 = vmatprep.subr.bf16.mxu1 %v2306_v21  ;;  %v2357_v57 = vld [vmem:[#allocation4 + $0x1a8] ss:$16 sps:$4 sm:$0xff]   ;;  %v2358_v58 = vld [vmem:[#allocation4 + $0x1c4] ss:$16 sps:$4 sm:$0xff]   ;;  %v2360_v59 = vld [vmem:[#allocation4 + $0x1cc] ss:$16 sps:$4 sm:$0xff]  }
  0x4a   :  { %1308 = vmatprep.mubr.bf16.mxu0 %v68_v48  ;;  %1472 = vmatprep.mubr.bf16.mxu1 %v68_v48  ;;  %v2362_v60 = vld [vmem:[#allocation4 + $0x1c0] ss:$16 sps:$4 sm:$0xff]   ;;  %v2363_v61 = vld [vmem:[#allocation4 + $0x1c8] ss:$16 sps:$4 sm:$0xff]   ;;  %v2364_v62 = vld [vmem:[#allocation4 + $0x1e4] ss:$16 sps:$4 sm:$0xff]  }
  0x4b   :  { %v2366_v63 = vld [vmem:[#allocation4 + $0x1ec] ss:$16 sps:$4 sm:$0xff]   ;;  %v2368_v0 = vld [vmem:[#allocation4 + $0x1e0] ss:$16 sps:$4 sm:$0xff]   ;;  %v2369_v1 = vld [vmem:[#allocation4 + $0x1e8] ss:$16 sps:$4 sm:$0xff]  }
  0x4c   :  { %1287 = vmatpush1.bf16.msra.mxu0 %v2308_v22  ;;  %1451 = vmatpush1.bf16.msra.mxu1 %v2309_v23  ;;  %v60_v2 = vld [vmem:[#allocation2] sm:$0xff]  ;;  %v2372_v3 = vld [vmem:[#allocation4 + $0x204] ss:$16 sps:$4 sm:$0xff]   ;;  %v2370_v6 = vld [vmem:[#allocation4 + $0x200] ss:$16 sps:$4 sm:$0xff]  }
  0x4d   :  { %1288 = vmatprep.subr.bf16.mxu0 %v2310_v24  ;;  %1452 = vmatprep.subr.bf16.mxu1 %v2312_v25  ;;  %v2375_v4 = vld [vmem:[#allocation4 + $0x20c] ss:$16 sps:$4 sm:$0xff]   ;;  %v67_v5 = vpack.c.bf16 %v60_v2, %v60_v2  ;;  %v2373_v7 = vld [vmem:[#allocation4 + $0x208] ss:$16 sps:$4 sm:$0xff]   ;;  %v2378_v8 = vld [vmem:[#allocation4 + $0x224] ss:$16 sps:$4 sm:$0xff]  }
  0x4e   :  { %v2381_v9 = vld [vmem:[#allocation4 + $0x22c] ss:$16 sps:$4 sm:$0xff]   ;;  %v2376_v10 = vld [vmem:[#allocation4 + $0x220] ss:$16 sps:$4 sm:$0xff]   ;;  %v2379_v11 = vld [vmem:[#allocation4 + $0x228] ss:$16 sps:$4 sm:$0xff]  }
  0x4f   :  { %v2384_v12 = vld [vmem:[#allocation4 + $0x244] ss:$16 sps:$4 sm:$0xff]   ;;  %v2387_v13 = vld [vmem:[#allocation4 + $0x24c] ss:$16 sps:$4 sm:$0xff]   ;;  %v2382_v14 = vld [vmem:[#allocation4 + $0x240] ss:$16 sps:$4 sm:$0xff]  }
  0x50   :  { %1289 = vmatpush1.bf16.msra.mxu0 %v2314_v26  ;;  %1453 = vmatpush1.bf16.msra.mxu1 %v2315_v27  ;;  %v2385_v15 = vld [vmem:[#allocation4 + $0x248] ss:$16 sps:$4 sm:$0xff]   ;;  %v2390_v16 = vld [vmem:[#allocation4 + $0x264] ss:$16 sps:$4 sm:$0xff]   ;;  %v2393_v17 = vld [vmem:[#allocation4 + $0x26c] ss:$16 sps:$4 sm:$0xff]  }
  0x51   :  { %1290 = vmatprep.subr.bf16.mxu0 %v2316_v28  ;;  %1454 = vmatprep.subr.bf16.mxu1 %v2318_v29  ;;  %v2388_v18 = vld [vmem:[#allocation4 + $0x260] ss:$16 sps:$4 sm:$0xff]   ;;  %v2391_v19 = vld [vmem:[#allocation4 + $0x268] ss:$16 sps:$4 sm:$0xff]   ;;  %v2396_v20 = vld [vmem:[#allocation4 + $0x284] ss:$16 sps:$4 sm:$0xff]  }
  0x52   :  { %v2399_v21 = vld [vmem:[#allocation4 + $0x28c] ss:$16 sps:$4 sm:$0xff]   ;;  %v2394_v22 = vld [vmem:[#allocation4 + $0x280] ss:$16 sps:$4 sm:$0xff]   ;;  %v2397_v23 = vld [vmem:[#allocation4 + $0x288] ss:$16 sps:$4 sm:$0xff]  }
  0x53   :  { %v2402_v24 = vld [vmem:[#allocation4 + $0x2a4] ss:$16 sps:$4 sm:$0xff]   ;;  %v2405_v25 = vld [vmem:[#allocation4 + $0x2ac] ss:$16 sps:$4 sm:$0xff]   ;;  %v2400_v26 = vld [vmem:[#allocation4 + $0x2a0] ss:$16 sps:$4 sm:$0xff]  }
  0x54   :  { %1291 = vmatpush1.bf16.msra.mxu0 %v2320_v30  ;;  %1455 = vmatpush1.bf16.msra.mxu1 %v2321_v31  ;;  %v2403_v27 = vld [vmem:[#allocation4 + $0x2a8] ss:$16 sps:$4 sm:$0xff]   ;;  %v2408_v28 = vld [vmem:[#allocation4 + $0x2c4] ss:$16 sps:$4 sm:$0xff]   ;;  %v2411_v29 = vld [vmem:[#allocation4 + $0x2cc] ss:$16 sps:$4 sm:$0xff]  }
  0x55   :  { %1292 = vmatprep.subr.bf16.mxu0 %v2322_v32  ;;  %1456 = vmatprep.subr.bf16.mxu1 %v2324_v33  ;;  %v63_v30 = vld [vmem:[#allocation2 + $0x18] sm:$0xff]  ;;  %v2409_v33 = vld [vmem:[#allocation4 + $0x2c8] ss:$16 sps:$4 sm:$0xff]  }
  0x56   :  { %v2406_v31 = vld [vmem:[#allocation4 + $0x2c0] ss:$16 sps:$4 sm:$0xff]   ;;  %v70_v32 = vpack.c.bf16 %v63_v30, %v63_v30  ;;  %v2432_v46 = vld [vmem:[#allocation4 + $0x344] ss:$16 sps:$4 sm:$0xff]  }
  0x57   :  { %v2430_v48 = vld [vmem:[#allocation4 + $0x340] ss:$16 sps:$4 sm:$0xff]   ;;  %v2462_v2 = vld [vmem:[#allocation4 + $0x3e4] ss:$16 sps:$4 sm:$0xff]  }
  0x58   :  { %1293 = vmatpush1.bf16.msra.mxu0 %v2326_v34  ;;  %1457 = vmatpush1.bf16.msra.mxu1 %v2327_v35  ;;  %v2414_v34 = vld [vmem:[#allocation4 + $0x2e4] ss:$16 sps:$4 sm:$0xff]   ;;  %v2417_v35 = vld [vmem:[#allocation4 + $0x2ec] ss:$16 sps:$4 sm:$0xff]  }
  0x59   :  { %1294 = vmatprep.subr.bf16.mxu0 %v2328_v36  ;;  %1458 = vmatprep.subr.bf16.mxu1 %v2330_v37  ;;  %v2412_v36 = vld [vmem:[#allocation4 + $0x2e0] ss:$16 sps:$4 sm:$0xff]   ;;  %v2415_v37 = vld [vmem:[#allocation4 + $0x2e8] ss:$16 sps:$4 sm:$0xff]   ;;  %v2498_v30 = vld [vmem:[#allocation4 + $0x4a4] ss:$16 sps:$4 sm:$0xff]  }
  0x5c   :  { %1295 = vmatpush1.bf16.msra.mxu0 %v2332_v38  ;;  %1459 = vmatpush1.bf16.msra.mxu1 %v2333_v39  ;;  %v2420_v38 = vld [vmem:[#allocation4 + $0x304] ss:$16 sps:$4 sm:$0xff]   ;;  %v2423_v39 = vld [vmem:[#allocation4 + $0x30c] ss:$16 sps:$4 sm:$0xff]  }
  0x5d   :  { %1296 = vmatprep.subr.bf16.mxu0 %v2334_v40  ;;  %1460 = vmatprep.subr.bf16.mxu1 %v2336_v41  ;;  %v2418_v40 = vld [vmem:[#allocation4 + $0x300] ss:$16 sps:$4 sm:$0xff]   ;;  %v2421_v41 = vld [vmem:[#allocation4 + $0x308] ss:$16 sps:$4 sm:$0xff]  }
  0x60   :  { %1297 = vmatpush1.bf16.msra.mxu0 %v2338_v42  ;;  %1461 = vmatpush1.bf16.msra.mxu1 %v2339_v43  ;;  %v2426_v42 = vld [vmem:[#allocation4 + $0x324] ss:$16 sps:$4 sm:$0xff]   ;;  %v2429_v43 = vld [vmem:[#allocation4 + $0x32c] ss:$16 sps:$4 sm:$0xff]  }
  0x61   :  { %1298 = vmatprep.subr.bf16.mxu0 %v2340_v44  ;;  %1462 = vmatprep.subr.bf16.mxu1 %v2342_v45  ;;  %v2424_v44 = vld [vmem:[#allocation4 + $0x320] ss:$16 sps:$4 sm:$0xff]   ;;  %v2427_v45 = vld [vmem:[#allocation4 + $0x328] ss:$16 sps:$4 sm:$0xff]  }
  0x64   :  { %1299 = vmatpush1.bf16.msra.mxu0 %v2344_v47  ;;  %1463 = vmatpush1.bf16.msra.mxu1 %v2345_v49  ;;  %v2435_v47 = vld [vmem:[#allocation4 + $0x34c] ss:$16 sps:$4 sm:$0xff]   ;;  %v2433_v49 = vld [vmem:[#allocation4 + $0x348] ss:$16 sps:$4 sm:$0xff]  }
  0x65   :  { %1300 = vmatprep.subr.bf16.mxu0 %v2346_v50  ;;  %1464 = vmatprep.subr.bf16.mxu1 %v2348_v51  ;;  %v2438_v50 = vld [vmem:[#allocation4 + $0x364] ss:$16 sps:$4 sm:$0xff]   ;;  %v2441_v51 = vld [vmem:[#allocation4 + $0x36c] ss:$16 sps:$4 sm:$0xff]  }
  0x68   :  { %1301 = vmatpush1.bf16.msra.mxu0 %v2350_v52  ;;  %1465 = vmatpush1.bf16.msra.mxu1 %v2351_v53  ;;  %v2436_v52 = vld [vmem:[#allocation4 + $0x360] ss:$16 sps:$4 sm:$0xff]   ;;  %v2439_v53 = vld [vmem:[#allocation4 + $0x368] ss:$16 sps:$4 sm:$0xff]  }
  0x69   :  { %1302 = vmatprep.subr.bf16.mxu0 %v2352_v54  ;;  %1466 = vmatprep.subr.bf16.mxu1 %v2354_v55  ;;  %v2444_v54 = vld [vmem:[#allocation4 + $0x384] ss:$16 sps:$4 sm:$0xff]   ;;  %v2447_v55 = vld [vmem:[#allocation4 + $0x38c] ss:$16 sps:$4 sm:$0xff]  }
  0x6c   :  { %1303 = vmatpush1.bf16.msra.mxu0 %v2356_v56  ;;  %1467 = vmatpush1.bf16.msra.mxu1 %v2357_v57  ;;  %v2442_v56 = vld [vmem:[#allocation4 + $0x380] ss:$16 sps:$4 sm:$0xff]   ;;  %v2445_v57 = vld [vmem:[#allocation4 + $0x388] ss:$16 sps:$4 sm:$0xff]  }
  0x6d   :  { %1304 = vmatprep.subr.bf16.mxu0 %v2358_v58  ;;  %1468 = vmatprep.subr.bf16.mxu1 %v2360_v59  ;;  %v2450_v58 = vld [vmem:[#allocation4 + $0x3a4] ss:$16 sps:$4 sm:$0xff]   ;;  %v2453_v59 = vld [vmem:[#allocation4 + $0x3ac] ss:$16 sps:$4 sm:$0xff]  }
  0x70   :  { %1305 = vmatpush1.bf16.msra.mxu0 %v2362_v60  ;;  %1469 = vmatpush1.bf16.msra.mxu1 %v2363_v61  ;;  %v2448_v60 = vld [vmem:[#allocation4 + $0x3a0] ss:$16 sps:$4 sm:$0xff]   ;;  %v2451_v61 = vld [vmem:[#allocation4 + $0x3a8] ss:$16 sps:$4 sm:$0xff]  }
  0x71   :  { %1306 = vmatprep.subr.bf16.mxu0 %v2364_v62  ;;  %1470 = vmatprep.subr.bf16.mxu1 %v2366_v63  ;;  %v2456_v62 = vld [vmem:[#allocation4 + $0x3c4] ss:$16 sps:$4 sm:$0xff]   ;;  %v2459_v63 = vld [vmem:[#allocation4 + $0x3cc] ss:$16 sps:$4 sm:$0xff]  }
  0x74   :  { %1307 = vmatpush1.bf16.msra.mxu0 %v2368_v0  ;;  %1471 = vmatpush1.bf16.msra.mxu1 %v2369_v1  ;;  %v2454_v0 = vld [vmem:[#allocation4 + $0x3c0] ss:$16 sps:$4 sm:$0xff]   ;;  %v2457_v1 = vld [vmem:[#allocation4 + $0x3c8] ss:$16 sps:$4 sm:$0xff]  }
  0x75   :  { %1317 = vmatprep.subr.bf16.mxu0 %v2372_v3  ;;  %1481 = vmatprep.subr.bf16.mxu1 %v2375_v4  ;;  %v2465_v3 = vld [vmem:[#allocation4 + $0x3ec] ss:$16 sps:$4 sm:$0xff]   ;;  %v2460_v4 = vld [vmem:[#allocation4 + $0x3e0] ss:$16 sps:$4 sm:$0xff]  }
  0x77   :  { %1309 = vmatmul.mubr.bf16.vlgmr.msra.gmra.mrb[0].mxu0 %v67_v5  ;;  %1473 = vmatmul.mubr.bf16.vlgmr.msra.gmra.mrb[0].mxu1 %v67_v5  ;;  %v2463_v5 = vld [vmem:[#allocation4 + $0x3e8] ss:$16 sps:$4 sm:$0xff]  }
  0x78   :  { %1318 = vmatpush1.bf16.msra.mxu0 %v2370_v6  ;;  %1482 = vmatpush1.bf16.msra.mxu1 %v2373_v7  ;;  %v2468_v6 = vld [vmem:[#allocation4 + $0x404] ss:$16 sps:$4 sm:$0xff]   ;;  %v62_v7 = vld [vmem:[#allocation2 + $0x10] sm:$0xff] }
  0x79   :  { %1319 = vmatprep.subr.bf16.mxu0 %v2378_v8  ;;  %1483 = vmatprep.subr.bf16.mxu1 %v2381_v9  ;;  %v2471_v8 = vld [vmem:[#allocation4 + $0x40c] ss:$16 sps:$4 sm:$0xff]   ;;  %v2466_v9 = vld [vmem:[#allocation4 + $0x400] ss:$16 sps:$4 sm:$0xff]  }
  0x7a   :  { %1349 = vmatprep.mubr.bf16.mxu0 %v70_v32  ;;  %1513 = vmatprep.mubr.bf16.mxu1 %v70_v32  ;;  %v2496_v32 = vld [vmem:[#allocation4 + $0x4a0] ss:$16 sps:$4 sm:$0xff]  }
  0x7c   :  { %1320 = vmatpush1.bf16.msra.mxu0 %v2376_v10  ;;  %1484 = vmatpush1.bf16.msra.mxu1 %v2379_v11  ;;  %v69_v10 = vpack.c.bf16 %v62_v7, %v62_v7  ;;  %v2469_v11 = vld [vmem:[#allocation4 + $0x408] ss:$16 sps:$4 sm:$0xff]   ;;  %v2561_v7 = vld [vmem:[#allocation4 + $0x5ec] ss:$16 sps:$4 sm:$0xff]  }
  0x7d   :  { %1321 = vmatprep.subr.bf16.mxu0 %v2384_v12  ;;  %1485 = vmatprep.subr.bf16.mxu1 %v2387_v13  ;;  %v2474_v12 = vld [vmem:[#allocation4 + $0x424] ss:$16 sps:$4 sm:$0xff]   ;;  %v2477_v13 = vld [vmem:[#allocation4 + $0x42c] ss:$16 sps:$4 sm:$0xff]  }
  0x80   :  { %1322 = vmatpush1.bf16.msra.mxu0 %v2382_v14  ;;  %1486 = vmatpush1.bf16.msra.mxu1 %v2385_v15  ;;  %v65_v14 = vld [vmem:[#allocation2 + $0x28] sm:$0xff] }
  0x81   :  { %1323 = vmatprep.subr.bf16.mxu0 %v2390_v16  ;;  %1487 = vmatprep.subr.bf16.mxu1 %v2393_v17  ;;  %v72_v15 = vpack.c.bf16 %v65_v14, %v65_v14  ;;  %v2472_v16 = vld [vmem:[#allocation4 + $0x420] ss:$16 sps:$4 sm:$0xff]   ;;  %v2475_v17 = vld [vmem:[#allocation4 + $0x428] ss:$16 sps:$4 sm:$0xff]  }
  0x82   :  { %v2562_v14 = vld [vmem:[#allocation4 + $0x600] ss:$16 sps:$4 sm:$0xff]  }
  0x84   :  { %1324 = vmatpush1.bf16.msra.mxu0 %v2388_v18  ;;  %1488 = vmatpush1.bf16.msra.mxu1 %v2391_v19  ;;  %v2480_v18 = vld [vmem:[#allocation4 + $0x444] ss:$16 sps:$4 sm:$0xff]   ;;  %v2483_v19 = vld [vmem:[#allocation4 + $0x44c] ss:$16 sps:$4 sm:$0xff]  }
  0x85   :  { %1325 = vmatprep.subr.bf16.mxu0 %v2396_v20  ;;  %1489 = vmatprep.subr.bf16.mxu1 %v2399_v21  ;;  %v2478_v20 = vld [vmem:[#allocation4 + $0x440] ss:$16 sps:$4 sm:$0xff]   ;;  %v2481_v21 = vld [vmem:[#allocation4 + $0x448] ss:$16 sps:$4 sm:$0xff]  }
  0x88   :  { %1326 = vmatpush1.bf16.msra.mxu0 %v2394_v22  ;;  %1490 = vmatpush1.bf16.msra.mxu1 %v2397_v23  ;;  %v2486_v22 = vld [vmem:[#allocation4 + $0x464] ss:$16 sps:$4 sm:$0xff]   ;;  %v2489_v23 = vld [vmem:[#allocation4 + $0x46c] ss:$16 sps:$4 sm:$0xff]  }
  0x89   :  { %1327 = vmatprep.subr.bf16.mxu0 %v2402_v24  ;;  %1491 = vmatprep.subr.bf16.mxu1 %v2405_v25  ;;  %v2484_v24 = vld [vmem:[#allocation4 + $0x460] ss:$16 sps:$4 sm:$0xff]   ;;  %v2487_v25 = vld [vmem:[#allocation4 + $0x468] ss:$16 sps:$4 sm:$0xff]  }
  0x8c   :  { %1328 = vmatpush1.bf16.msra.mxu0 %v2400_v26  ;;  %1492 = vmatpush1.bf16.msra.mxu1 %v2403_v27  ;;  %v2492_v26 = vld [vmem:[#allocation4 + $0x484] ss:$16 sps:$4 sm:$0xff]   ;;  %v2495_v27 = vld [vmem:[#allocation4 + $0x48c] ss:$16 sps:$4 sm:$0xff]  }
  0x8d   :  { %1329 = vmatprep.subr.bf16.mxu0 %v2408_v28  ;;  %1493 = vmatprep.subr.bf16.mxu1 %v2411_v29  ;;  %v2490_v28 = vld [vmem:[#allocation4 + $0x480] ss:$16 sps:$4 sm:$0xff]   ;;  %v2493_v29 = vld [vmem:[#allocation4 + $0x488] ss:$16 sps:$4 sm:$0xff]  }
  0x90   :  { %1330 = vmatpush1.bf16.msra.mxu0 %v2406_v31  ;;  %1494 = vmatpush1.bf16.msra.mxu1 %v2409_v33  ;;  %v2501_v31 = vld [vmem:[#allocation4 + $0x4ac] ss:$16 sps:$4 sm:$0xff]   ;;  %v2499_v33 = vld [vmem:[#allocation4 + $0x4a8] ss:$16 sps:$4 sm:$0xff]  }
  0x91   :  { %1331 = vmatprep.subr.bf16.mxu0 %v2414_v34  ;;  %1495 = vmatprep.subr.bf16.mxu1 %v2417_v35  ;;  %v2504_v34 = vld [vmem:[#allocation4 + $0x4c4] ss:$16 sps:$4 sm:$0xff]   ;;  %v2507_v35 = vld [vmem:[#allocation4 + $0x4cc] ss:$16 sps:$4 sm:$0xff]  }
  0x94   :  { %1332 = vmatpush1.bf16.msra.mxu0 %v2412_v36  ;;  %1496 = vmatpush1.bf16.msra.mxu1 %v2415_v37  ;;  %v2502_v36 = vld [vmem:[#allocation4 + $0x4c0] ss:$16 sps:$4 sm:$0xff]   ;;  %v2505_v37 = vld [vmem:[#allocation4 + $0x4c8] ss:$16 sps:$4 sm:$0xff]  }
  0x95   :  { %1333 = vmatprep.subr.bf16.mxu0 %v2420_v38  ;;  %1497 = vmatprep.subr.bf16.mxu1 %v2423_v39  ;;  %v2510_v38 = vld [vmem:[#allocation4 + $0x4e4] ss:$16 sps:$4 sm:$0xff]   ;;  %v2513_v39 = vld [vmem:[#allocation4 + $0x4ec] ss:$16 sps:$4 sm:$0xff]  }
  0x98   :  { %1334 = vmatpush1.bf16.msra.mxu0 %v2418_v40  ;;  %1498 = vmatpush1.bf16.msra.mxu1 %v2421_v41  ;;  %v2508_v40 = vld [vmem:[#allocation4 + $0x4e0] ss:$16 sps:$4 sm:$0xff]   ;;  %v2511_v41 = vld [vmem:[#allocation4 + $0x4e8] ss:$16 sps:$4 sm:$0xff]  }
  0x99   :  { %1335 = vmatprep.subr.bf16.mxu0 %v2426_v42  ;;  %1499 = vmatprep.subr.bf16.mxu1 %v2429_v43  ;;  %v2516_v42 = vld [vmem:[#allocation4 + $0x504] ss:$16 sps:$4 sm:$0xff]   ;;  %v2519_v43 = vld [vmem:[#allocation4 + $0x50c] ss:$16 sps:$4 sm:$0xff]  }
  0x9c   :  { %1336 = vmatpush1.bf16.msra.mxu0 %v2424_v44  ;;  %1500 = vmatpush1.bf16.msra.mxu1 %v2427_v45  ;;  %v2514_v44 = vld [vmem:[#allocation4 + $0x500] ss:$16 sps:$4 sm:$0xff]   ;;  %v2517_v45 = vld [vmem:[#allocation4 + $0x508] ss:$16 sps:$4 sm:$0xff]  }
  0x9d   :  { %1337 = vmatprep.subr.bf16.mxu0 %v2432_v46  ;;  %1501 = vmatprep.subr.bf16.mxu1 %v2435_v47  ;;  %v2522_v46 = vld [vmem:[#allocation4 + $0x524] ss:$16 sps:$4 sm:$0xff]   ;;  %v2525_v47 = vld [vmem:[#allocation4 + $0x52c] ss:$16 sps:$4 sm:$0xff]  }
  0xa0   :  { %1338 = vmatpush1.bf16.msra.mxu0 %v2430_v48  ;;  %1502 = vmatpush1.bf16.msra.mxu1 %v2433_v49  ;;  %v2520_v48 = vld [vmem:[#allocation4 + $0x520] ss:$16 sps:$4 sm:$0xff]   ;;  %v2523_v49 = vld [vmem:[#allocation4 + $0x528] ss:$16 sps:$4 sm:$0xff]  }
  0xa1   :  { %1339 = vmatprep.subr.bf16.mxu0 %v2438_v50  ;;  %1503 = vmatprep.subr.bf16.mxu1 %v2441_v51  ;;  %v2528_v50 = vld [vmem:[#allocation4 + $0x544] ss:$16 sps:$4 sm:$0xff]   ;;  %v2531_v51 = vld [vmem:[#allocation4 + $0x54c] ss:$16 sps:$4 sm:$0xff]  }
  0xa4   :  { %1340 = vmatpush1.bf16.msra.mxu0 %v2436_v52  ;;  %1504 = vmatpush1.bf16.msra.mxu1 %v2439_v53  ;;  %v2526_v52 = vld [vmem:[#allocation4 + $0x540] ss:$16 sps:$4 sm:$0xff]   ;;  %v2529_v53 = vld [vmem:[#allocation4 + $0x548] ss:$16 sps:$4 sm:$0xff]  }
  0xa5   :  { %1341 = vmatprep.subr.bf16.mxu0 %v2444_v54  ;;  %1505 = vmatprep.subr.bf16.mxu1 %v2447_v55  ;;  %v2534_v54 = vld [vmem:[#allocation4 + $0x564] ss:$16 sps:$4 sm:$0xff]   ;;  %v2537_v55 = vld [vmem:[#allocation4 + $0x56c] ss:$16 sps:$4 sm:$0xff]  }
  0xa8   :  { %1342 = vmatpush1.bf16.msra.mxu0 %v2442_v56  ;;  %1506 = vmatpush1.bf16.msra.mxu1 %v2445_v57  ;;  %v2532_v56 = vld [vmem:[#allocation4 + $0x560] ss:$16 sps:$4 sm:$0xff]   ;;  %v2535_v57 = vld [vmem:[#allocation4 + $0x568] ss:$16 sps:$4 sm:$0xff]  }
  0xa9   :  { %1343 = vmatprep.subr.bf16.mxu0 %v2450_v58  ;;  %1507 = vmatprep.subr.bf16.mxu1 %v2453_v59  ;;  %v2540_v58 = vld [vmem:[#allocation4 + $0x584] ss:$16 sps:$4 sm:$0xff]   ;;  %v2543_v59 = vld [vmem:[#allocation4 + $0x58c] ss:$16 sps:$4 sm:$0xff]  }
  0xac   :  { %1344 = vmatpush1.bf16.msra.mxu0 %v2448_v60  ;;  %1508 = vmatpush1.bf16.msra.mxu1 %v2451_v61  ;;  %v2538_v60 = vld [vmem:[#allocation4 + $0x580] ss:$16 sps:$4 sm:$0xff]   ;;  %v2541_v61 = vld [vmem:[#allocation4 + $0x588] ss:$16 sps:$4 sm:$0xff]  }
  0xad   :  { %1345 = vmatprep.subr.bf16.mxu0 %v2456_v62  ;;  %1509 = vmatprep.subr.bf16.mxu1 %v2459_v63  ;;  %v2546_v62 = vld [vmem:[#allocation4 + $0x5a4] ss:$16 sps:$4 sm:$0xff]   ;;  %v2549_v63 = vld [vmem:[#allocation4 + $0x5ac] ss:$16 sps:$4 sm:$0xff]  }
  0xb0   :  { %1346 = vmatpush1.bf16.msra.mxu0 %v2454_v0  ;;  %1510 = vmatpush1.bf16.msra.mxu1 %v2457_v1  ;;  %v2544_v0 = vld [vmem:[#allocation4 + $0x5a0] ss:$16 sps:$4 sm:$0xff]   ;;  %v2547_v1 = vld [vmem:[#allocation4 + $0x5a8] ss:$16 sps:$4 sm:$0xff]  }
  0xb1   :  { %1347 = vmatprep.subr.bf16.mxu0 %v2462_v2  ;;  %1511 = vmatprep.subr.bf16.mxu1 %v2465_v3  ;;  %v2552_v2 = vld [vmem:[#allocation4 + $0x5c4] ss:$16 sps:$4 sm:$0xff]   ;;  %v2555_v3 = vld [vmem:[#allocation4 + $0x5cc] ss:$16 sps:$4 sm:$0xff]  }
  0xb4   :  { %1348 = vmatpush1.bf16.msra.mxu0 %v2460_v4  ;;  %1512 = vmatpush1.bf16.msra.mxu1 %v2463_v5  ;;  %v2550_v4 = vld [vmem:[#allocation4 + $0x5c0] ss:$16 sps:$4 sm:$0xff]   ;;  %v2553_v5 = vld [vmem:[#allocation4 + $0x5c8] ss:$16 sps:$4 sm:$0xff]  }
  0xb5   :  { %1358 = vmatprep.subr.bf16.mxu0 %v2468_v6  ;;  %1522 = vmatprep.subr.bf16.mxu1 %v2471_v8  ;;  %v2558_v6 = vld [vmem:[#allocation4 + $0x5e4] ss:$16 sps:$4 sm:$0xff]   ;;  %v2556_v8 = vld [vmem:[#allocation4 + $0x5e0] ss:$16 sps:$4 sm:$0xff]  }
  0xb7   :  { %1350 = vmatmul.mubr.bf16.vlgmr.msra.gmra.mrb[0].mxu0 %v69_v10  ;;  %1514 = vmatmul.mubr.bf16.vlgmr.msra.gmra.mrb[0].mxu1 %v69_v10  ;;  %v64_v10 = vld [vmem:[#allocation2 + $0x20] sm:$0xff] }
  0xb8   :  { %1359 = vmatpush1.bf16.msra.mxu0 %v2466_v9  ;;  %1523 = vmatpush1.bf16.msra.mxu1 %v2469_v11  ;;  %v2559_v9 = vld [vmem:[#allocation4 + $0x5e8] ss:$16 sps:$4 sm:$0xff]   ;;  %v2564_v11 = vld [vmem:[#allocation4 + $0x604] ss:$16 sps:$4 sm:$0xff]  }
  0xb9   :  { %1360 = vmatprep.subr.bf16.mxu0 %v2474_v12  ;;  %1524 = vmatprep.subr.bf16.mxu1 %v2477_v13  ;;  %v2567_v12 = vld [vmem:[#allocation4 + $0x60c] ss:$16 sps:$4 sm:$0xff]   ;;  %v71_v13 = vpack.c.bf16 %v64_v10, %v64_v10 }
  0xba   :  { %1390 = vmatprep.mubr.bf16.mxu0 %v72_v15  ;;  %1554 = vmatprep.mubr.bf16.mxu1 %v72_v15  ;;  %v2565_v15 = vld [vmem:[#allocation4 + $0x608] ss:$16 sps:$4 sm:$0xff]  }
  0xbc   :  { %1361 = vmatpush1.bf16.msra.mxu0 %v2472_v16  ;;  %1525 = vmatpush1.bf16.msra.mxu1 %v2475_v17  ;;  %v2568_v16 = vld [vmem:[#allocation6 + $0x40] sm:$0xff]  }
  0xbd   :  { %1362 = vmatprep.subr.bf16.mxu0 %v2480_v18  ;;  %1526 = vmatprep.subr.bf16.mxu1 %v2483_v19  ;;  %v2569_v17 = vld [vmem:[#allocation6 + $0xc0] sm:$0xff]   ;;  %v2677_v18 = vmov 0   ;;  %v66_v19 = vld [vmem:[#allocation2 + $0x30] sm:$0xff] }
  0xc0   :  { %1363 = vmatpush1.bf16.msra.mxu0 %v2478_v20  ;;  %1527 = vmatpush1.bf16.msra.mxu1 %v2481_v21  ;;  %v73_v20 = vpack.c.bf16 %v66_v19, %v66_v19  ;;  %v2570_v21 = vld [vmem:[#allocation6] sm:$0xff]  }
  0xc1   :  { %1364 = vmatprep.subr.bf16.mxu0 %v2486_v22  ;;  %1528 = vmatprep.subr.bf16.mxu1 %v2489_v23  ;;  %v2571_v22 = vld [vmem:[#allocation6 + $0x80] sm:$0xff]   ;;  %v2572_v23 = vld [vmem:[#allocation6 + $0x48] sm:$0xff]  }
  0xc4   :  { %1365 = vmatpush1.bf16.msra.mxu0 %v2484_v24  ;;  %1529 = vmatpush1.bf16.msra.mxu1 %v2487_v25  ;;  %v2573_v24 = vld [vmem:[#allocation6 + $0xc8] sm:$0xff]  }
  0xc5   :  { %1366 = vmatprep.subr.bf16.mxu0 %v2492_v26  ;;  %1530 = vmatprep.subr.bf16.mxu1 %v2495_v27  ;;  %v2574_v25 = vld [vmem:[#allocation6 + $0x8] sm:$0xff]   ;;  %v2576_v27 = vld [vmem:[#allocation6 + $0x50] sm:$0xff]  }
  0xc6   :  { %v2575_v26 = vld [vmem:[#allocation6 + $0x88] sm:$0xff]  }
  0xc8   :  { %1367 = vmatpush1.bf16.msra.mxu0 %v2490_v28  ;;  %1531 = vmatpush1.bf16.msra.mxu1 %v2493_v29  ;;  %v2577_v28 = vld [vmem:[#allocation6 + $0xd0] sm:$0xff]  }
  0xc9   :  { %1368 = vmatprep.subr.bf16.mxu0 %v2498_v30  ;;  %1532 = vmatprep.subr.bf16.mxu1 %v2501_v31  ;;  %v2578_v29 = vld [vmem:[#allocation6 + $0x10] sm:$0xff]   ;;  %v2580_v31 = vld [vmem:[#allocation6 + $0x58] sm:$0xff]  }
  0xca   :  { %v2579_v30 = vld [vmem:[#allocation6 + $0x90] sm:$0xff]  }
  0xcc   :  { %1369 = vmatpush1.bf16.msra.mxu0 %v2496_v32  ;;  %1533 = vmatpush1.bf16.msra.mxu1 %v2499_v33  ;;  %v2581_v32 = vld [vmem:[#allocation6 + $0xd8] sm:$0xff]  }
  0xcd   :  { %1370 = vmatprep.subr.bf16.mxu0 %v2504_v34  ;;  %1534 = vmatprep.subr.bf16.mxu1 %v2507_v35  ;;  %v2582_v33 = vld [vmem:[#allocation6 + $0x18] sm:$0xff]   ;;  %v2584_v35 = vld [vmem:[#allocation6 + $0x60] sm:$0xff]  }
  0xce   :  { %v2583_v34 = vld [vmem:[#allocation6 + $0x98] sm:$0xff]  }
  0xd0   :  { %1371 = vmatpush1.bf16.msra.mxu0 %v2502_v36  ;;  %1535 = vmatpush1.bf16.msra.mxu1 %v2505_v37  ;;  %v2585_v36 = vld [vmem:[#allocation6 + $0xe0] sm:$0xff]  }
  0xd1   :  { %1372 = vmatprep.subr.bf16.mxu0 %v2510_v38  ;;  %1536 = vmatprep.subr.bf16.mxu1 %v2513_v39  ;;  %v2586_v37 = vld [vmem:[#allocation6 + $0x20] sm:$0xff]   ;;  %v2588_v39 = vld [vmem:[#allocation6 + $0x68] sm:$0xff]  }
  0xd2   :  { %v2587_v38 = vld [vmem:[#allocation6 + $0xa0] sm:$0xff]  }
  0xd4   :  { %1373 = vmatpush1.bf16.msra.mxu0 %v2508_v40  ;;  %1537 = vmatpush1.bf16.msra.mxu1 %v2511_v41  ;;  %v2589_v40 = vld [vmem:[#allocation6 + $0xe8] sm:$0xff]  }
  0xd5   :  { %1374 = vmatprep.subr.bf16.mxu0 %v2516_v42  ;;  %1538 = vmatprep.subr.bf16.mxu1 %v2519_v43  ;;  %v2590_v41 = vld [vmem:[#allocation6 + $0x28] sm:$0xff]   ;;  %v2592_v43 = vld [vmem:[#allocation6 + $0x70] sm:$0xff]  }
  0xd6   :  { %v2591_v42 = vld [vmem:[#allocation6 + $0xa8] sm:$0xff]  }
  0xd8   :  { %1375 = vmatpush1.bf16.msra.mxu0 %v2514_v44  ;;  %1539 = vmatpush1.bf16.msra.mxu1 %v2517_v45  ;;  %v2593_v44 = vld [vmem:[#allocation6 + $0xf0] sm:$0xff]  }
  0xd9   :  { %1376 = vmatprep.subr.bf16.mxu0 %v2522_v46  ;;  %1540 = vmatprep.subr.bf16.mxu1 %v2525_v47  ;;  %v2594_v45 = vld [vmem:[#allocation6 + $0x30] sm:$0xff]   ;;  %v2596_v47 = vld [vmem:[#allocation6 + $0x78] sm:$0xff]  }
  0xda   :  { %v2595_v46 = vld [vmem:[#allocation6 + $0xb0] sm:$0xff]  }
  0xdc   :  { %1377 = vmatpush1.bf16.msra.mxu0 %v2520_v48  ;;  %1541 = vmatpush1.bf16.msra.mxu1 %v2523_v49  ;;  %v2597_v48 = vld [vmem:[#allocation6 + $0xf8] sm:$0xff]  }
  0xdd   :  { %1378 = vmatprep.subr.bf16.mxu0 %v2528_v50  ;;  %1542 = vmatprep.subr.bf16.mxu1 %v2531_v51  ;;  %v2598_v49 = vld [vmem:[#allocation6 + $0x38] sm:$0xff]   ;;  %v272_v51 = vlaneseq }
  0xde   :  { %v2599_v50 = vld [vmem:[#allocation6 + $0xb8] sm:$0xff]  }
  0xe0   :  { %1379 = vmatpush1.bf16.msra.mxu0 %v2526_v52  ;;  %1543 = vmatpush1.bf16.msra.mxu1 %v2529_v53  ;;  %v273_v52 = vshrl.u32 %v272_v51, 7 }
  0xe1   :  { %1380 = vmatprep.subr.bf16.mxu0 %v2534_v54  ;;  %1544 = vmatprep.subr.bf16.mxu1 %v2537_v55  ;;  %v270_v55 = vld [vmem:[%s2755_s2] sm:$0xf] }
  0xe2   :  { %v274_v53 = vsub.s32 0, %v273_v52  ;;  %v282_v54 = vsub.s32 2, %v273_v52 }
  0xe4   :  { %1381 = vmatpush1.bf16.msra.mxu0 %v2532_v56  ;;  %1545 = vmatpush1.bf16.msra.mxu1 %v2535_v57  ;;  %v278_v56 = vsub.s32 1, %v273_v52  ;;  %v286_v57 = vsub.s32 3, %v273_v52 }
  0xe5   :  { %1382 = vmatprep.subr.bf16.mxu0 %v2540_v58  ;;  %1546 = vmatprep.subr.bf16.mxu1 %v2543_v59  ;;  %v275_v58 = vrot.slane %v270_v55, %v274_v53  ;;  %v283_v59 = vrot.slane %v270_v55, %v282_v54 }
  0xe8   :  { %1383 = vmatpush1.bf16.msra.mxu0 %v2538_v60  ;;  %1547 = vmatpush1.bf16.msra.mxu1 %v2541_v61  ;;  %v279_v60 = vrot.slane %v270_v55, %v278_v56  ;;  %v287_v61 = vrot.slane %v270_v55, %v286_v57 }
  0xe9   :  { %1384 = vmatprep.subr.bf16.mxu0 %v2546_v62  ;;  %1548 = vmatprep.subr.bf16.mxu1 %v2549_v63 }
  0xec   :  { %1385 = vmatpush1.bf16.msra.mxu0 %v2544_v0  ;;  %1549 = vmatpush1.bf16.msra.mxu1 %v2547_v1 }
  0xed   :  { %1386 = vmatprep.subr.bf16.mxu0 %v2552_v2  ;;  %1550 = vmatprep.subr.bf16.mxu1 %v2555_v3 }
  0xf0   :  { %1387 = vmatpush1.bf16.msra.mxu0 %v2550_v4  ;;  %1551 = vmatpush1.bf16.msra.mxu1 %v2553_v5 }
  0xf1   :  { %1388 = vmatprep.subr.bf16.mxu0 %v2558_v6  ;;  %1552 = vmatprep.subr.bf16.mxu1 %v2561_v7 }
  0xf4   :  { %1389 = vmatpush1.bf16.msra.mxu0 %v2556_v8  ;;  %1553 = vmatpush1.bf16.msra.mxu1 %v2559_v9 }
  0xf5   :  { %1399 = vmatprep.subr.bf16.mxu0 %v2564_v11  ;;  %1563 = vmatprep.subr.bf16.mxu1 %v2567_v12 }
  0xf7   :  { %1391 = vmatmul.mubr.bf16.vlgmr.msra.gmra.mrb[0].mxu0 %v71_v13  ;;  %1555 = vmatmul.mubr.bf16.vlgmr.msra.gmra.mrb[0].mxu1 %v71_v13 }
  0xf8   :  { %1400 = vmatpush1.bf16.msra.mxu0 %v2562_v14  ;;  %1564 = vmatpush1.bf16.msra.mxu1 %v2565_v15 }
  0xf9   :  { %1431 = vmatprep.mubr.bf16.mxu0 %v2677_v18  ;;  %1595 = vmatprep.mubr.bf16.mxu1 %v2677_v18 }
  0xfa   :  { %2194 = vmatprep.subr.bf16.mxu0 %v2568_v16  ;;  %2216 = vmatprep.subr.bf16.mxu1 %v2569_v17 }
 0x103   :  { %2159 = vmatmul.mubr.msk.bf16.vlgmr.msra.gmra.mrb[0].mxu0 %vm1272_vm0, %v73_v20  ;;  %2160 = vmatmul.mubr.msk.bf16.vlgmr.msra.gmra.mrb[0].mxu1 %vm1272_vm0, %v73_v20  ;;  %v2161_v20 = vld [vmem:[%s2757_s4] ss:$0 sm:$0xff] }
 0x104   :  { %2195 = vmatpush3.bf16.msra.mxu0 %v2570_v21  ;;  %2217 = vmatpush3.bf16.msra.mxu1 %v2571_v22 }
 0x105   :  { %2196 = vmatprep.subr.bf16.mxu0 %v2572_v23  ;;  %2218 = vmatprep.subr.bf16.mxu1 %v2573_v24 }
 0x108   :  { %2197 = vmatpush3.bf16.msra.mxu0 %v2574_v25  ;;  %2219 = vmatpush3.bf16.msra.mxu1 %v2575_v26 }
 0x109   :  { %2198 = vmatprep.subr.bf16.mxu0 %v2576_v27  ;;  %2220 = vmatprep.subr.bf16.mxu1 %v2577_v28 }
 0x10c   :  { %2199 = vmatpush3.bf16.msra.mxu0 %v2578_v29  ;;  %2221 = vmatpush3.bf16.msra.mxu1 %v2579_v30 }
 0x10d   :  { %2200 = vmatprep.subr.bf16.mxu0 %v2580_v31  ;;  %2222 = vmatprep.subr.bf16.mxu1 %v2581_v32 }
 0x110   :  { %2201 = vmatpush3.bf16.msra.mxu0 %v2582_v33  ;;  %2223 = vmatpush3.bf16.msra.mxu1 %v2583_v34 }
 0x111   :  { %2202 = vmatprep.subr.bf16.mxu0 %v2584_v35  ;;  %2224 = vmatprep.subr.bf16.mxu1 %v2585_v36 }
 0x114   :  { %2203 = vmatpush3.bf16.msra.mxu0 %v2586_v37  ;;  %2225 = vmatpush3.bf16.msra.mxu1 %v2587_v38 }
 0x115   :  { %2204 = vmatprep.subr.bf16.mxu0 %v2588_v39  ;;  %2226 = vmatprep.subr.bf16.mxu1 %v2589_v40 }
 0x118   :  { %2205 = vmatpush3.bf16.msra.mxu0 %v2590_v41  ;;  %2227 = vmatpush3.bf16.msra.mxu1 %v2591_v42 }
 0x119   :  { %2206 = vmatprep.subr.bf16.mxu0 %v2592_v43  ;;  %2228 = vmatprep.subr.bf16.mxu1 %v2593_v44 }
 0x11c   :  { %2207 = vmatpush3.bf16.msra.mxu0 %v2594_v45  ;;  %2229 = vmatpush3.bf16.msra.mxu1 %v2595_v46 }
 0x11d   :  { %2208 = vmatprep.subr.bf16.mxu0 %v2596_v47  ;;  %2230 = vmatprep.subr.bf16.mxu1 %v2597_v48 }
 0x120   :  { %2209 = vmatpush3.bf16.msra.mxu0 %v2598_v49  ;;  %2231 = vmatpush3.bf16.msra.mxu1 %v2599_v50 }
 0x1d6   :  { %v1433_v62 = vpop.f32.mrb[0].mxu0  ;;  %v1597_v63 = vpop.f32.mrb[0].mxu1 }
 0x1d7   :  { %v2238_v0 = vadd.f32 %v1433_v62, %v275_v58  ;;  %v2240_v1 = vadd.f32 %v1597_v63, %v283_v59  ;;  %v1435_v2 = vpop.f32.mrb[1].mxu0  ;;  %v1599_v3 = vpop.f32.mrb[1].mxu1 }
 0x1d8   :  { %v2239_v4 = vadd.f32 %v1435_v2, %v279_v60  ;;  %v2241_v5 = vadd.f32 %v1599_v3, %v287_v61  ;;  %v1437_v6 = vpop.f32.mrb[2].mxu0  ;;  %v1601_v7 = vpop.f32.mrb[2].mxu1 }
 0x1d9   :  { %v1604_v8 = vmax.f32 %v2238_v0, 0.0  ;;  %v1606_v9 = vmax.f32 %v2240_v1, 0.0  ;;  %v1438_v10 = vpop.f32.mrb[3].mxu0  ;;  %v1602_v11 = vpop.f32.mrb[3].mxu1 }
 0x1da   :  { %v1605_v12 = vmax.f32 %v2239_v4, 0.0  ;;  %v1607_v13 = vmax.f32 %v2241_v5, 0.0 }
 0x1db   :  { %v1608_v16 = vpack.c.bf16 %v1604_v8, %v1604_v8  ;;  %v1610_v17 = vpack.c.bf16 %v1606_v9, %v1606_v9 }
 0x1dc   :  { %v1609_v14 = vpack.c.bf16 %v1605_v12, %v1605_v12  ;;  %v1611_v15 = vpack.c.bf16 %v1607_v13, %v1607_v13 }
 0x1de   :  { %1907 = vmatprep.mubr.bf16.mxu0 %v1609_v14  ;;  %1947 = vmatprep.mubr.bf16.mxu1 %v1611_v15 }
 0x1df   :  { %1908 = vmatmul.mubr.bf16.vlgmr.msra.gmra.mrb[4].mxu0 %v1608_v16  ;;  %1948 = vmatmul.mubr.bf16.vlgmr.msra.gmra.mrb[4].mxu1 %v1610_v17 }
 0x2b2   :  { %v2210_v18 = vpop.f32.mrb[4].mxu0  ;;  %v2232_v19 = vpop.f32.mrb[4].mxu1 }
 0x2b3   :  { %v2211_v21 = vpop.f32.mrb[5].mxu0  ;;  %v2233_v22 = vpop.f32.mrb[5].mxu1 }
 0x2b4   :  { %v2212_v23 = vadd.f32 %v2211_v21, %v2210_v18  ;;  %v2234_v24 = vadd.f32 %v2233_v22, %v2232_v19  ;;  %v2213_v25 = vpop.f32.mrb[6].mxu0  ;;  %v2235_v26 = vpop.f32.mrb[6].mxu1 }
 0x2b5   :  { %v2214_v27 = vpop.f32.mrb[7].mxu0  ;;  %v2236_v28 = vpop.f32.mrb[7].mxu1 }
 0x2b6   :  { %v1910_v29 = vadd.f32 %v2212_v23, %v2161_v20 }
 0x2b8   :  { %v1950_v30 = vadd.f32 %v2234_v24, %v1910_v29 }
 0x2ba   :  { %v1955_v31 = vpack.c.bf16 %v1950_v30, %v1950_v30 }
 0x2bc   :  { %1956 = vst [vmem:[%s2758_s5] sm:$0xf] %v1955_v31 }
 0x2bd   :  { %1961 = vsyncpa [#allocation3], 1 }
 0x2be   :  { %1962 = vsyncpa [#allocation5], 1 }

</bundles_post_ra>
